<compile_context>
chip_gen: v7x
topology: tpu7x:2x2x1
jax: 0.10.0
libtpu: 0.0.40
codegen_flags: <defaults>
</compile_context>

<pallas_src>
import functools
import math

import jax
import jax.numpy as jnp
from jax.experimental import pallas as pl
from jax.experimental.pallas import tpu as pltpu


def _round_up(x, mult):
    return (x + mult - 1) // mult * mult


def _l2_normalize_rows(v, eps=1e-12):
    """F.normalize(v, dim=-1): v / max(||v||, eps) == v * rsqrt(max(sumsq, eps^2))."""
    v = v.astype(jnp.float32)
    ss = jnp.sum(v * v, axis=-1, keepdims=True)
    return v * jax.lax.rsqrt(jnp.maximum(ss, jnp.float32(eps) * jnp.float32(eps)))


def _arcface_kernel(x_ref, w_ref, label_ref, out_ref, *, s, cos_m, sin_m, th, mm,
                    easy_margin, ls_eps, out_features, block_c, matmul_dtype,
                    label_is_none):
    # x_ref:     (TM, Dp) f32   raw input rows (normalized here, once per tile)
    # w_ref:     (TN, Dp)       weight rows, L2-normalized in the wrapper
    # label_ref: (TM, 1)  int32
    # out_ref:   (TM, TN) f32
    xn = _l2_normalize_rows(x_ref[...]).astype(matmul_dtype)
    w = w_ref[...]

    # cosine = xn @ w.T, expressed as a transposed contraction so Mosaic feeds
    # the MXU directly (no XLU transpose of the weight tile).  f32 accumulate.
    cosine = jax.lax.dot_general(
        xn, w,
        dimension_numbers=(((1,), (1,)), ((), ())),
        preferred_element_type=jnp.float32)           # (TM, TN)

    if label_is_none:
        # PyTorch forward: `if label is None: return cosine`
        out_ref[...] = cosine.astype(out_ref.dtype)
        return

    # Clamp avoids NaN when |cosine| exceeds 1 by a few ULP (MXU rounding).
    sine = jnp.sqrt(jnp.maximum(1.0 - cosine * cosine, 0.0))
    phi = cosine * cos_m - sine * sin_m
    if easy_margin:
        phi = jnp.where(cosine > 0.0, phi, cosine)
    else:
        phi = jnp.where(cosine > th, phi, cosine - mm)

    # one_hot via iota comparison, offset by this class tile's origin.
    col0 = pl.program_id(1) * block_c
    classes = jax.lax.broadcasted_iota(jnp.int32, cosine.shape, 1) + col0
    one_hot = (classes == label_ref[...]).astype(jnp.float32)
    if ls_eps > 0.0:
        one_hot = (1.0 - ls_eps) * one_hot + ls_eps / out_features

    out_ref[...] = ((one_hot * phi + (1.0 - one_hot) * cosine) * s).astype(out_ref.dtype)


def arc_margin_product(x, weight, label=None, *, s=30.0, m=0.5, easy_margin=False,
                       ls_eps=0.0, matmul_dtype=jnp.bfloat16,
                       block_b=128, block_c=256):
    """ArcFace forward.  x: (B, D) f32, weight: (C, D) f32, label: (B,) int or None."""
    B, D = x.shape
    C, D2 = weight.shape
    assert D == D2

    cos_m = math.cos(m)
    sin_m = math.sin(m)
    th = math.cos(math.pi - m)
    mm = math.sin(math.pi - m) * m

    # Hoist the weight normalization out of the kernel (otherwise it would be
    # redone once per batch tile); cast to the matmul dtype to halve DMA bytes.
    w_n = _l2_normalize_rows(weight).astype(matmul_dtype)

    # Tile sizes: sublane/lane aligned, capped at the (padded) problem size.
    tm = min(block_b, _round_up(B, 8))
    tn = min(block_c, _round_up(C, 128))
    bp = _round_up(B, tm)
    cp = _round_up(C, tn)
    dp = _round_up(D, 128)

    x_p = jnp.zeros((bp, dp), jnp.float32).at[:B, :D].set(x.astype(jnp.float32))
    w_p = jnp.zeros((cp, dp), matmul_dtype).at[:C, :D].set(w_n)
    if label is None:
        label_p = jnp.zeros((bp, 1), jnp.int32)
    else:
        label_p = jnp.zeros((bp, 1), jnp.int32).at[:B, 0].set(label.astype(jnp.int32))

    grid = (bp // tm, cp // tn)

    kernel = functools.partial(
        _arcface_kernel,
        s=float(s), cos_m=cos_m, sin_m=sin_m, th=th, mm=mm,
        easy_margin=bool(easy_margin), ls_eps=float(ls_eps), out_features=C,
        block_c=tn, matmul_dtype=matmul_dtype, label_is_none=(label is None))

    w_itemsize = jnp.dtype(matmul_dtype).itemsize
    cost = pl.CostEstimate(
        flops=2 * bp * cp * dp,
        transcendentals=bp * cp + bp,  # sqrt per logit + rsqrt per row
        bytes_accessed=int(x_p.size * 4
                           + w_p.size * w_itemsize * (bp // tm)
                           + label_p.size * 4
                           + bp * cp * 4),
    )

    out = pl.pallas_call(
        kernel,
        out_shape=jax.ShapeDtypeStruct((bp, cp), jnp.float32),
        grid=grid,
        in_specs=[
            pl.BlockSpec((tm, dp), lambda i, j: (i, 0)),   # x batch tile (resident over j)
            pl.BlockSpec((tn, dp), lambda i, j: (j, 0)),   # normalized W class tile (streamed)
            pl.BlockSpec((tm, 1), lambda i, j: (i, 0)),    # labels per batch tile
        ],
        out_specs=pl.BlockSpec((tm, tn), lambda i, j: (i, j)),
        compiler_params=pltpu.CompilerParams(
            dimension_semantics=("parallel", "parallel")),
        cost_estimate=cost,
    )(x_p, w_p, label_p)

    return out[:B, :C]


def arc_margin_product_ref(x, weight, label, *, s=30.0, m=0.5, easy_margin=False,
                           ls_eps=0.0, matmul_dtype=jnp.float32):
    """Pure-JAX reference mirroring the PyTorch forward (optionally with the
    same matmul-input dtype as the kernel so comparisons stay tight)."""
    xn = _l2_normalize_rows(x).astype(matmul_dtype)
    wn = _l2_normalize_rows(weight).astype(matmul_dtype)
    cosine = jnp.dot(xn, wn.T, preferred_element_type=jnp.float32)
    if label is None:
        return cosine
    sine = jnp.sqrt(jnp.maximum(1.0 - cosine * cosine, 0.0))
    cos_m, sin_m = math.cos(m), math.sin(m)
    th = math.cos(math.pi - m)
    mm = math.sin(math.pi - m) * m
    phi = cosine * cos_m - sine * sin_m
    if easy_margin:
        phi = jnp.where(cosine > 0, phi, cosine)
    else:
        phi = jnp.where(cosine > th, phi, cosine - mm)
    one_hot = jax.nn.one_hot(label, weight.shape[0], dtype=jnp.float32)
    if ls_eps > 0:
        one_hot = (1 - ls_eps) * one_hot + ls_eps / weight.shape[0]
    return (one_hot * phi + (1.0 - one_hot) * cosine) * s


if __name__ == "__main__":
    in_features = 32
    out_features = 16
    batch = 8

    key = jax.random.PRNGKey(0)
    kx, kw, kl = jax.random.split(key, 3)

    # Deterministic init matching reset_parameters(): W ~ U(-stdv, stdv).
    stdv = 1.0 / math.sqrt(in_features)
    W = jax.random.uniform(kw, (out_features, in_features),
                           minval=-stdv, maxval=stdv, dtype=jnp.float32)
    x = jax.random.normal(kx, (batch, in_features), dtype=jnp.float32)
    label = jax.random.randint(kl, (batch,), 0, out_features, dtype=jnp.int32)

    # 1) f32 matmul path: tight check against the f32 reference.
    out_f32 = jax.block_until_ready(
        arc_margin_product(x, W, label, s=30.0, m=0.5, easy_margin=False,
                           ls_eps=0.0, matmul_dtype=jnp.float32))
    ref_f32 = arc_margin_product_ref(x, W, label, s=30.0, m=0.5,
                                     easy_margin=False, ls_eps=0.0,
                                     matmul_dtype=jnp.float32)
    assert out_f32.shape == (batch, out_features)
    assert jnp.allclose(out_f32, ref_f32, atol=5e-3, rtol=5e-3), "f32 path mismatch"

    # 2) bf16 matmul path (fast default): compare against a reference that uses
    #    the same bf16 rounding of the normalized matmul inputs.
    out_bf16 = jax.block_until_ready(
        arc_margin_product(x, W, label, s=30.0, m=0.5, easy_margin=False,
                           ls_eps=0.0, matmul_dtype=jnp.bfloat16))
    ref_bf16 = arc_margin_product_ref(x, W, label, s=30.0, m=0.5,
                                      easy_margin=False, ls_eps=0.0,
                                      matmul_dtype=jnp.bfloat16)
    assert jnp.allclose(out_bf16, ref_bf16, atol=1e-2, rtol=1e-2), "bf16 path mismatch"

    # 3) Exercise easy_margin / label-smoothing branches (f32 path).
    out_em = jax.block_until_ready(
        arc_margin_product(x, W, label, s=30.0, m=0.5, easy_margin=True,
                           ls_eps=0.1, matmul_dtype=jnp.float32))
    ref_em = arc_margin_product_ref(x, W, label, s=30.0, m=0.5,
                                    easy_margin=True, ls_eps=0.1,
                                    matmul_dtype=jnp.float32)
    assert jnp.allclose(out_em, ref_em, atol=5e-3, rtol=5e-3), "easy_margin/ls_eps mismatch"

    # 4) label=None branch returns the raw cosine matrix.
    out_none = jax.block_until_ready(
        arc_margin_product(x, W, None, matmul_dtype=jnp.float32))
    ref_none = arc_margin_product_ref(x, W, None, matmul_dtype=jnp.float32)
    assert jnp.allclose(out_none, ref_none, atol=5e-4, rtol=5e-4), "label=None mismatch"

    print("KERNEL_OK")
</pallas_src>

<mosaic_0001>
module attributes {stable_mosaic.version = 11 : i64} {
  func.func @_arcface_kernel(%arg0: i32, %arg1: i32, %arg2: memref<8x128xf32, #tpu.memory_space<vmem>>, %arg3: memref<128x128xf32, #tpu.memory_space<vmem>>, %arg4: memref<8x1xi32, #tpu.memory_space<vmem>>, %arg5: memref<8x128xf32, #tpu.memory_space<vmem>>) attributes {dimension_semantics = [#tpu.dimension_semantics<parallel>, #tpu.dimension_semantics<parallel>], iteration_bounds = array<i64: 1, 1>, scalar_prefetch = 0 : i64, scratch_operands = 0 : i64, tpu.core_type = #tpu.core_type<tc>, window_params = [{transform_indices = @transform_0, window_bounds = array<i64: 8, 128>}, {transform_indices = @transform_1, window_bounds = array<i64: 128, 128>}, {transform_indices = @transform_2, window_bounds = array<i64: 8, 1>}, {transform_indices = @transform_3, window_bounds = array<i64: 8, 128>}]} {
    %c0 = arith.constant 0 : index
    %c0_0 = arith.constant 0 : index
    %0 = vector.load %arg2[%c0, %c0_0] : memref<8x128xf32, #tpu.memory_space<vmem>>, vector<8x128xf32>
    %1 = arith.mulf %0, %0 : vector<8x128xf32>
    %cst = arith.constant dense<0.000000e+00> : vector<8xf32>
    %2 = vector.multi_reduction <add>, %1, %cst [1] : vector<8x128xf32> to vector<8xf32>
    %3 = vector.shape_cast %2 : vector<8xf32> to vector<8x1xf32>
    %cst_1 = arith.constant 9.99999996E-13 : f32
    %cst_2 = arith.constant 9.99999996E-13 : f32
    %4 = arith.mulf %cst_1, %cst_2 : f32
    %5 = vector.broadcast %4 : f32 to vector<8x1xf32>
    %6 = arith.maximumf %3, %5 : vector<8x1xf32>
    %7 = math.rsqrt %6 : vector<8x1xf32>
    %8 = vector.broadcast %7 : vector<8x1xf32> to vector<8x128xf32>
    %9 = arith.mulf %0, %8 : vector<8x128xf32>
    %c0_3 = arith.constant 0 : index
    %c0_4 = arith.constant 0 : index
    %10 = vector.load %arg3[%c0_3, %c0_4] : memref<128x128xf32, #tpu.memory_space<vmem>>, vector<128x128xf32>
    %cst_5 = arith.constant dense<0.000000e+00> : vector<8x128xf32>
    %11 = tpu.matmul %9, %10, %cst_5 {dimension_numbers = #tpu.dot_dimension_numbers<[1], [1], [0], [0], [0, 0, 1, 0], [], []>} : vector<8x128xf32>, vector<128x128xf32>, vector<8x128xf32> -> vector<8x128xf32>
    %12 = arith.mulf %11, %11 : vector<8x128xf32>
    %cst_6 = arith.constant 1.000000e+00 : f32
    %13 = vector.broadcast %cst_6 : f32 to vector<8x128xf32>
    %14 = arith.subf %13, %12 : vector<8x128xf32>
    %cst_7 = arith.constant 0.000000e+00 : f32
    %15 = vector.broadcast %cst_7 : f32 to vector<8x128xf32>
    %16 = arith.maximumf %14, %15 : vector<8x128xf32>
    %17 = math.sqrt %16 : vector<8x128xf32>
    %cst_8 = arith.constant 0.87758255 : f32
    %18 = vector.broadcast %cst_8 : f32 to vector<8x128xf32>
    %19 = arith.mulf %11, %18 : vector<8x128xf32>
    %cst_9 = arith.constant 0.47942555 : f32
    %20 = vector.broadcast %cst_9 : f32 to vector<8x128xf32>
    %21 = arith.mulf %17, %20 : vector<8x128xf32>
    %22 = arith.subf %19, %21 : vector<8x128xf32>
    %cst_10 = arith.constant -0.87758255 : f32
    %23 = vector.broadcast %cst_10 : f32 to vector<8x128xf32>
    %24 = arith.cmpf ogt, %11, %23 : vector<8x128xf32>
    %cst_11 = arith.constant 0.239712775 : f32
    %25 = vector.broadcast %cst_11 : f32 to vector<8x128xf32>
    %26 = arith.subf %11, %25 : vector<8x128xf32>
    %27 = arith.select %24, %22, %26 : vector<8x128xi1>, vector<8x128xf32>
    %c128_i32 = arith.constant 128 : i32
    %28 = arith.muli %arg1, %c128_i32 : i32
    %29 = tpu.iota {dimensions = array<i32: 1>} : vector<8x128xi32>
    %30 = vector.broadcast %28 : i32 to vector<8x128xi32>
    %31 = arith.addi %29, %30 : vector<8x128xi32>
    %c0_12 = arith.constant 0 : index
    %c0_13 = arith.constant 0 : index
    %32 = vector.load %arg4[%c0_12, %c0_13] : memref<8x1xi32, #tpu.memory_space<vmem>>, vector<8x1xi32>
    %33 = vector.broadcast %32 : vector<8x1xi32> to vector<8x128xi32>
    %34 = arith.cmpi eq, %31, %33 : vector<8x128xi32>
    %35 = arith.extui %34 : vector<8x128xi1> to vector<8x128xi32>
    %36 = arith.sitofp %35 : vector<8x128xi32> to vector<8x128xf32>
    %37 = arith.mulf %36, %27 : vector<8x128xf32>
    %cst_14 = arith.constant 1.000000e+00 : f32
    %38 = vector.broadcast %cst_14 : f32 to vector<8x128xf32>
    %39 = arith.subf %38, %36 : vector<8x128xf32>
    %40 = arith.mulf %39, %11 : vector<8x128xf32>
    %41 = arith.addf %37, %40 : vector<8x128xf32>
    %cst_15 = arith.constant 3.000000e+01 : f32
    %42 = vector.broadcast %cst_15 : f32 to vector<8x128xf32>
    %43 = arith.mulf %41, %42 : vector<8x128xf32>
    %c0_16 = arith.constant 0 : index
    %c0_17 = arith.constant 0 : index
    %44 = vector.load %arg5[%c0_16, %c0_17] : memref<8x128xf32, #tpu.memory_space<vmem>>, vector<8x128xf32>
    tpu.vector_store %arg5[%c0_16, %c0_17], %43 {strides = array<i32>} : memref<8x128xf32, #tpu.memory_space<vmem>>, vector<8x128xf32>,
    return
  }
  func.func @transform_0(%arg0: i32, %arg1: i32) -> (i32, i32) {
    %c0_i32 = arith.constant 0 : i32
    %c0_i32_0 = arith.constant 0 : i32
    return %arg0, %c0_i32 : i32, i32
  }
  func.func @transform_1(%arg0: i32, %arg1: i32) -> (i32, i32) {
    %c0_i32 = arith.constant 0 : i32
    %c0_i32_0 = arith.constant 0 : i32
    return %arg1, %c0_i32 : i32, i32
  }
  func.func @transform_2(%arg0: i32, %arg1: i32) -> (i32, i32) {
    %c0_i32 = arith.constant 0 : i32
    %c0_i32_0 = arith.constant 0 : i32
    return %arg0, %c0_i32 : i32, i32
  }
  func.func @transform_3(%arg0: i32, %arg1: i32) -> (i32, i32) {
    %c0_i32 = arith.constant 0 : i32
    return %arg0, %arg1 : i32, i32
  }
}

</mosaic_0001>

<bundles_post_ra>
// kernel: tpu_custom_call.1
= control target key start
LH: loop header
LB: loop body
LE: loop exit
PB: predicated region body
PF: predicated region fallthrough
CT: control target
= control target key end

     0   :  { %8 = vsyncpa [#allocation3], 0  ;;  %s368_s0 = inlined_call_operand.vmem [shape: f32[8,128], index: 0, kind: input, shape index: {}]   ;;  %s369_s1 = inlined_call_operand.hbm [shape: f32[128,128], index: 1, kind: input, shape index: {}]   ;;  %s370_s2 = inlined_call_operand.vmem [shape: s32[8,1], index: 2, kind: input, shape index: {}]   ;;  %s371_s3 = inlined_call_operand.hbm [shape: f32[8,128], index: 3, kind: output, shape index: {}]  }
   0x1   :  { %9 = vsyncpa [#allocation4], 0  ;;  %s310_s12 = smov [#allocation2]   ;;  %s262_s16 = scalar_lea.hbm %s369_s1, 2048 }
   0x2   :  { %s17_s13 = sshll.u32 %s310_s12, 4  ;;  %p263_p0 = scmp.ne.s32.totalorder %s369_s1, %s262_s16  ;;  %s18_s13 = int_to_ptr.vmem [resolvable:$true] %s17_s13 }
   0x3   :  { %p266_p1 = scmp.lt.u32.totalorder %s262_s16, %s369_s1 }
   0x5   :  { %p268_p2 = pnand %p266_p1, %p263_p0 }
   0x7   :  { %271 = shalt.err (!%p268_p2)
}
   0x8   :  { %s272_s21 = scalar_lea.vmem %s18_s13, 2048  ;;  %p277_p4 = scmp.lt.s32.totalorder %s18_s13, %s18_s13 }
   0x9   :  { %p273_p3 = scmp.ne.s32.totalorder %s18_s13, %s272_s21  ;;  %p278_p5 = scmp.lt.s32.totalorder %s272_s21, %s272_s21 }
   0xb   :  { %p279_p6 = por %p278_p5, %p277_p4 }
   0xd   :  { %p280_p7 = pnand %p279_p6, %p273_p3 }
   0xf   :  { %283 = shalt.err (!%p280_p7)
}
  0x10   :  { %s311_s22 = smov 128   ;;  %s312_s23 = smov 8  }
  0x11   :  { %23 = dma.hbm_to_vmem [thread:$0]  %s369_s1, 2048, %s18_s13, [#allocation3], %s311_s22, %s311_s22, %s312_s23  }
  0x12   :  { %306 = dma.done.wait [#allocation3], 2048  }
  0x13   :  { %307 = vsyncadd [#allocation3], 4294965248  ;;  %v313_v0 = vmov 0.0|0.0   ;;  %v29_v1 = vld [vmem:[%s368_s0] sm:$0xff]  ;;  %v37_v3 = vld [vmem:[#allocation2 + $0x8] sm:$0xff]  ;;  %vm314_vm0 = vmmov 0   ;;  %v139_v39 = vlaneseq }
  0x14   :  { %225 = vmatprep.subr.bf16.mxu0 %v313_v0  ;;  %v36_v2 = vld [vmem:[#allocation2] sm:$0xff]  ;;  %v30_v4 = vmul.f32 %v29_v1, %v29_v1  ;;  %v38_v6 = vld [vmem:[#allocation2 + $0x10] sm:$0xff]  ;;  %v39_v7 = vld [vmem:[#allocation2 + $0x18] sm:$0xff]  ;;  %v315_v14 = vmov 0.0   ;;  %v316_v20 = vmov 0  }
  0x15   :  { %v226_v5 = vpack.c.bf16 %v37_v3, %v36_v2  ;;  %v229_v8 = vpack.c.bf16 %v39_v7, %v38_v6  ;;  %v40_v9 = vld [vmem:[#allocation2 + $0x20] sm:$0xff]  ;;  %v41_v10 = vld [vmem:[#allocation2 + $0x28] sm:$0xff]  ;;  %v42_v12 = vld [vmem:[#allocation2 + $0x30] sm:$0xff]  ;;  %222 = vmatprep.mubr.msk.f32.mxu0 %vm314_vm0, %v315_v14  ;;  %257 = vset.pattern.permute.xlu0 %v316_v20  ;;  %v140_v40 = vand.u32 127, %v139_v39 }
  0x16   :  { %31 = vadd.xlane.f32.xlu0 %v30_v4  ;;  %v232_v11 = vpack.c.bf16 %v41_v10, %v40_v9  ;;  %v43_v13 = vld [vmem:[#allocation2 + $0x38] sm:$0xff]  ;;  %v44_v16 = vld [vmem:[#allocation2 + $0x40] sm:$0xff]  ;;  %v45_v17 = vld [vmem:[#allocation2 + $0x48] sm:$0xff] }
  0x17   :  { %227 = vmatpush3.bf16.xpose.msra.mxu0 %v226_v5  ;;  %v235_v15 = vpack.c.bf16 %v43_v13, %v42_v12  ;;  %v238_v18 = vpack.c.bf16 %v45_v17, %v44_v16  ;;  %v143_v19 = vld [vmem:[%s370_s2] sm:$0xff]  ;;  %v46_v21 = vld [vmem:[#allocation2 + $0x50] sm:$0xff]  ;;  %v47_v22 = vld [vmem:[#allocation2 + $0x58] sm:$0xff]  ;;  %s317_s2 = smov [#allocation5]  }
  0x18   :  { %228 = vmatprep.subr.bf16.mxu0 %v313_v0  ;;  %v241_v23 = vpack.c.bf16 %v47_v22, %v46_v21  ;;  %v48_v24 = vld [vmem:[#allocation2 + $0x60] sm:$0xff]  ;;  %v49_v25 = vld [vmem:[#allocation2 + $0x68] sm:$0xff]  ;;  %v50_v27 = vld [vmem:[#allocation2 + $0x70] sm:$0xff]  ;;  %s162_s28 = sshll.u32 %s317_s2, 4  ;;  %s163_s28 = int_to_ptr.vmem [resolvable:$true] %s162_s28 }
  0x19   :  { %v244_v26 = vpack.c.bf16 %v49_v25, %v48_v24  ;;  %v51_v28 = vld [vmem:[#allocation2 + $0x78] sm:$0xff]  ;;  %s284_s29 = scalar_lea.vmem %s163_s28, 128  ;;  %p289_p9 = scmp.lt.s32.totalorder %s163_s28, %s163_s28 }
  0x1a   :  { %v247_v29 = vpack.c.bf16 %v51_v28, %v50_v27  ;;  %p285_p8 = scmp.ne.s32.totalorder %s163_s28, %s284_s29  ;;  %p290_p10 = scmp.lt.s32.totalorder %s284_s29, %s284_s29 }
  0x1c   :  { %p291_p11 = por %p290_p10, %p289_p9 }
  0x1e   :  { %p292_p12 = pnand %p291_p11, %p285_p8 }
  0x1f   :  { %230 = vmatpush3.bf16.xpose.msra.mxu0 %v229_v8 }
  0x20   :  { %231 = vmatprep.subr.bf16.mxu0 %v313_v0 }
  0x27   :  { %233 = vmatpush3.bf16.xpose.msra.mxu0 %v232_v11 }
  0x28   :  { %234 = vmatprep.subr.bf16.mxu0 %v313_v0 }
  0x2c   :  { %145 = vperm.xlu0 %257, %v143_v19  }
  0x2f   :  { %236 = vmatpush3.bf16.xpose.msra.mxu0 %v235_v15 }
  0x30   :  { %237 = vmatprep.subr.bf16.mxu0 %v313_v0 }
  0x37   :  { %239 = vmatpush3.bf16.xpose.msra.mxu0 %v238_v18 }
  0x38   :  { %240 = vmatprep.subr.bf16.mxu0 %v313_v0 }
  0x3f   :  { %242 = vmatpush3.bf16.xpose.msra.mxu0 %v241_v23 }
  0x40   :  { %243 = vmatprep.subr.bf16.mxu0 %v313_v0 }
  0x47   :  { %245 = vmatpush3.bf16.xpose.msra.mxu0 %v244_v26 }
  0x48   :  { %246 = vmatprep.subr.bf16.mxu0 %v313_v0 }
  0x4f   :  { %248 = vmatpush3.bf16.xpose.msra.mxu0 %v247_v29 }
  0xa3   :  { %v32_v30 = vpop.xlane.xlu0 %31 }
  0xa4   :  { %v33_v31 = vmax.f32 %v32_v30, 1e-24 }
  0xa6   :  { %258 = vrsqrt.f32 %v33_v31 }
  0xab   :  { %v146_v41 = vpop.permute.xlu0 %145 }
  0xac   :  { %vm147_vm1 = vcmp.eq.s32.totalorder %v140_v40, %v146_v41 }
  0xad   :  { %v172_v45 = vsel %vm147_vm1, 1.0, %v315_v14 }
  0xae   :  { %v151_v50 = vsub.f32 1.0, %v172_v45 }
  0xb0   :  { %v259_v32 = vpop.eup %258 }
  0xb1   :  { %v35_v33 = vmul.f32 %v259_v32, %v29_v1 }
  0xb3   :  { %223 = vmatmul.mubr.f32.vlgmr.msra.gmra.mrb[0].mxu0 %v35_v33 }
 0x186   :  { %v118_v34 = vpop.f32.mrb[0].mxu0 }
 0x187   :  { %v122_v35 = vmul.f32 %v118_v34, %v118_v34  ;;  %v224_v36 = vpop.f32.mrb[1].mxu0  ;;  %v132_v48 = vmul.f32 0.87758255, %v118_v34  ;;  %v171_v52 = vadd.f32 -0.23971277, %v118_v34  ;;  %v152_v55 = vmul.f32 %v151_v50, %v118_v34 }
 0x188   :  { %vm135_vm4 = vcmp.gt.f32.partialorder %v118_v34, -0.87758255 }
 0x189   :  { %v123_v37 = vsub.f32 1.0, %v122_v35 }
 0x18b   :  { %v124_v38 = vmax.f32 %v123_v37, 0.0 }
 0x18d   :  { %260 = vrsqrt.f32 %v124_v38  ;;  %vm127_vm2 = vcmp.eq.f32.partialorder %v124_v38, inf  ;;  %v130_v44 = vand.u32 2147483648, %v124_v38  ;;  %vm129_vm3 = vcmp.eq.f32.partialorder %v124_v38, 0.0 }
 0x197   :  { %v261_v42 = vpop.eup %260 }
 0x198   :  { %v126_v43 = vmul.f32 %v261_v42, %v124_v38 }
 0x19a   :  { %v128_v46 = vsel %vm127_vm2, %v124_v38, %v126_v43 }
 0x19b   :  { %v131_v47 = vsel %vm129_vm3, %v130_v44, %v128_v46 }
 0x19c   :  { %v133_v49 = vmul.f32 0.47942555, %v131_v47 }
 0x19e   :  { %v134_v51 = vsub.f32 %v132_v48, %v133_v49 }
 0x1a0   :  { %v137_v53 = vsel %vm135_vm4, %v134_v51, %v171_v52 }
 0x1a1   :  { %v150_v54 = vmul.f32 %v172_v45, %v137_v53 }
 0x1a3   :  { %v153_v56 = vadd.f32 %v152_v55, %v150_v54 }
 0x1a5   :  { %v154_v57 = vmul.f32 30.0, %v153_v56 }
 0x1a7   :  { %155 = vst [vmem:[#allocation5] sm:$0xff] %v154_v57 }
 0x1a8   :  { %295 = shalt.err (!%p292_p12)
}
 0x1a9   :  { %s296_s5 = scalar_lea.hbm %s371_s3, 128 }
 0x1aa   :  { %p297_p13 = scmp.ne.s32.totalorder %s371_s3, %s296_s5  ;;  %p300_p0 = scmp.lt.u32.totalorder %s296_s5, %s371_s3 }
 0x1ac   :  { %p302_p1 = pnand %p300_p0, %p297_p13 }
 0x1ae   :  { %305 = shalt.err (!%p302_p1)
}
 0x1af   :  { %165 = dma.vmem_to_hbm [thread:$0]  %s163_s28, 128, %s371_s3, [#allocation4]  }
 0x1b0   :  { %308 = dma.done.wait [#allocation4], 128  }
 0x1b1   :  { %309 = vsyncadd [#allocation4], 4294967168 }
 0x1b2   :  { %169 = vsyncpa [#allocation3], 1 }
 0x1b3   :  { %170 = vsyncpa [#allocation4], 1 }

</bundles_post_ra>
